<compile_context>
chip_gen: v7x
topology: tpu7x:2x2x1
jax: 0.10.0
libtpu: 0.0.40
codegen_flags: <defaults>
</compile_context>

<pallas_src>
import functools

import jax
import jax.numpy as jnp
from jax.experimental import pallas as pl
from jax.experimental.pallas import tpu as pltpu


def _round_up(x, m):
    return ((x + m - 1) // m) * m


# ----------------------------------------------------------------------------
# Pallas kernel: one batch tile per grid step, weights resident in VMEM
# ----------------------------------------------------------------------------
def aittm_kernel(xc_ref, xs_ref,
                 wct_ref, bc_ref,       # cell tower:  (D, HP), (1, HP)
                 wst_ref, bs_ref,       # site tower:  (D, HP), (1, HP)
                 wit_ref, bi_ref,       # info layer:  (HP, HP), (1, HP)
                 wqkv_ref,              # fused Q/K/V: (HP, 3*HP), 128-lane aligned segments
                 whc_ref, whs_ref, bh_ref,   # fused heads: (HP, PO), (HP, PO), (1, PO)
                 out_ref,               # packed output: (TB, PO)
                 *, h_dim, n_cell):
    HP = wct_ref.shape[1]
    mm_dt = wct_ref.dtype          # matmul input dtype (f32 or bf16); accumulation is f32
    f32 = jnp.float32

    xc = xc_ref[...]                                            # (TB, D)
    xs = xs_ref[...]                                            # (TB, D)

    # --- Towers + info layer: Linear + ReLU (MXU, f32 accumulate; biases stay f32) ---
    h_site = jnp.maximum(
        jnp.dot(xs, wst_ref[...], preferred_element_type=f32) + bs_ref[...], 0.0)
    h_cell = jnp.maximum(
        jnp.dot(xc, wct_ref[...], preferred_element_type=f32) + bc_ref[...], 0.0)
    h_info = jnp.maximum(
        jnp.dot(h_site.astype(mm_dt), wit_ref[...], preferred_element_type=f32)
        + bi_ref[...], 0.0)

    # --- Attention over the 2-token sequence (token0 = cell, token1 = info) ---
    # Per-token fused QKV matmuls (no axis-0 concat, no row slicing); the 3 segments
    # of wqkv are padded to 128-lane multiples so the column slices are free.
    qkv_c = jnp.dot(h_cell.astype(mm_dt), wqkv_ref[...], preferred_element_type=f32)
    qkv_i = jnp.dot(h_info.astype(mm_dt), wqkv_ref[...], preferred_element_type=f32)
    q_c, k_c, v_c = qkv_c[:, :HP], qkv_c[:, HP:2 * HP], qkv_c[:, 2 * HP:]
    q_i, k_i, v_i = qkv_i[:, :HP], qkv_i[:, HP:2 * HP], qkv_i[:, 2 * HP:]

    scale = 1.0 / (float(h_dim) ** 0.5)
    a_c = jnp.sum(q_c * k_c, axis=-1, keepdims=True) * scale    # (TB, 1)
    a_i = jnp.sum(q_i * k_i, axis=-1, keepdims=True) * scale
    m = jnp.maximum(a_c, a_i)                                   # stabilized 2-way softmax
    e_c = jnp.exp(a_c - m)
    e_i = jnp.exp(a_i - m)
    den = e_c + e_i
    inv_den = pl.reciprocal(den, approx=True)                   # EUP slot (VALU stays free)
    inv_den = inv_den * (2.0 - den * inv_den)                   # one NR step -> full f32 accuracy
    x_att = (e_c * inv_den) * v_c + (e_i * inv_den) * v_i       # (TB, HP)

    # --- Fused heads -> single lane-dense packed output ---
    #   lanes [0, C): cell logits (+bias), lane C: sigmoid(site logit + bias), rest 0.
    pre = (jnp.dot(x_att.astype(mm_dt), whc_ref[...], preferred_element_type=f32)
           + jnp.dot(h_site.astype(mm_dt), whs_ref[...], preferred_element_type=f32)
           + bh_ref[...])                                       # (TB, PO)
    lane = jax.lax.broadcasted_iota(jnp.int32, pre.shape, 1)
    out_ref[...] = jnp.where(lane == n_cell, jax.nn.sigmoid(pre), pre)


# ----------------------------------------------------------------------------
# Wrapper: host-side weight prep (transpose, lane padding, head fusion) + pallas_call
# ----------------------------------------------------------------------------
def aittm_forward(x_cell, x_site, p, *, block_b=512, weight_dtype=jnp.float32):
    # weight_dtype=jnp.bfloat16 halves the dominant HBM traffic at large batch
    # (accumulation and softmax/sigmoid math stay in f32); demo below uses f32.
    B, D = x_cell.shape
    H = p["w_site"].shape[0]
    C = p["w_oc"].shape[0]
    HP = _round_up(H, 128)          # hidden dim padded to a lane-tile multiple
    PO = _round_up(C + 1, 128)      # packed output lanes: [cell logits | site | zero pad]

    f32 = jnp.float32
    wdt = weight_dtype

    def pad2(w, rows, cols):        # zero-pad a 2-D weight up to (rows, cols)
        return jnp.pad(w, ((0, rows - w.shape[0]), (0, cols - w.shape[1])))

    # Pre-transposed, lane-padded weights (kernel only does row-major x @ W matmuls).
    w_cell_t = pad2(p["w_cell"].T, D, HP).astype(wdt)                       # (D, HP)
    w_site_t = pad2(p["w_site"].T, D, HP).astype(wdt)                       # (D, HP)
    w_info_t = pad2(p["w_info"].T, HP, HP).astype(wdt)                      # (HP, HP)
    w_qkv_t = jnp.concatenate(
        [pad2(p[k].T, HP, HP) for k in ("wq", "wk", "wv")], axis=1).astype(wdt)  # (HP, 3HP)

    # Fused heads: cell head -> lanes [0,C), site head -> lane C of one PO-lane slab.
    w_hc = jnp.zeros((HP, PO), f32).at[:H, :C].set(p["w_oc"].T).astype(wdt)     # (HP, PO)
    w_hs = jnp.zeros((HP, PO), f32).at[:H, C].set(p["w_os"][0]).astype(wdt)     # (HP, PO)
    b_h = jnp.zeros((1, PO), f32).at[0, :C].set(p["b_oc"]).at[0, C].set(p["b_os"][0])

    # Biases stay f32 (lane-padded with zeros).
    b_cell = jnp.pad(p["b_cell"], (0, HP - H)).reshape(1, HP).astype(f32)
    b_site = jnp.pad(p["b_site"], (0, HP - H)).reshape(1, HP).astype(f32)
    b_info = jnp.pad(p["b_info"], (0, HP - H)).reshape(1, HP).astype(f32)

    # Batch tiling: big M tiles feed the MXU / amortize per-step overhead; tile rows
    # are a multiple of 8 (f32) / 16 (bf16) sublanes, or the full (small) batch.
    if B <= block_b:
        TB, Bp = B, B
    else:
        TB = block_b
        Bp = _round_up(B, TB)

    xc = x_cell.astype(wdt)
    xs = x_site.astype(wdt)
    if Bp != B:
        xc = jnp.pad(xc, ((0, Bp - B), (0, 0)))
        xs = jnp.pad(xs, ((0, Bp - B), (0, 0)))

    grid = (Bp // TB,)
    batch_spec = pl.BlockSpec((TB, D), lambda b: (b, 0))
    out_spec = pl.BlockSpec((TB, PO), lambda b: (b, 0))

    def const_spec(shape):          # weights/biases: same block every step -> VMEM-resident
        return pl.BlockSpec(shape, lambda b: (0, 0))
    # NOTE: constant-index blocks could additionally use pipeline_mode=pl.Buffered(1)
    # to reclaim their second buffer on v7x; footprint here is tiny so it is omitted.

    in_bytes = jnp.dtype(wdt).itemsize
    weight_bytes = (2 * D * HP + HP * HP + 3 * HP * HP + 2 * HP * PO) * in_bytes \
                   + (3 * HP + PO) * 4
    est = 2 * (2 * TB * D * in_bytes) + 2 * TB * PO * 4 + 2 * weight_bytes
    # Clamp so a tile tuned for v5e/v6e (128 MiB) cannot blow v7x's 64 MiB VMEM.
    vmem_limit = int(min(max(2 * est, 16 << 20), 48 << 20))

    packed = pl.pallas_call(
        functools.partial(aittm_kernel, h_dim=H, n_cell=C),
        out_shape=jax.ShapeDtypeStruct((Bp, PO), f32),
        grid_spec=pltpu.PrefetchScalarGridSpec(
            num_scalar_prefetch=0,
            grid=grid,
            in_specs=[
                batch_spec, batch_spec,
                const_spec((D, HP)), const_spec((1, HP)),
                const_spec((D, HP)), const_spec((1, HP)),
                const_spec((HP, HP)), const_spec((1, HP)),
                const_spec((HP, 3 * HP)),
                const_spec((HP, PO)), const_spec((HP, PO)), const_spec((1, PO)),
            ],
            out_specs=out_spec,
        ),
        compiler_params=pltpu.CompilerParams(
            dimension_semantics=("parallel",),
            vmem_limit_bytes=vmem_limit,
        ),
    )(xc, xs,
      w_cell_t, b_cell, w_site_t, b_site, w_info_t, b_info,
      w_qkv_t, w_hc, w_hs, b_h)

    out_cell = packed[:B, :C]
    out_site = packed[:B, C:C + 1]
    return out_cell, out_site


# ----------------------------------------------------------------------------
# Pure-JAX reference (mirrors the PyTorch module) for validation
# ----------------------------------------------------------------------------
def ref_aittm(x_cell, x_site, p):
    def lin(x, w, b=None):
        y = x @ w.T
        return y if b is None else y + b

    h_site = jnp.maximum(lin(x_site, p["w_site"], p["b_site"]), 0.0)
    h_info = jnp.maximum(lin(h_site, p["w_info"], p["b_info"]), 0.0)
    h_cell = jnp.maximum(lin(x_cell, p["w_cell"], p["b_cell"]), 0.0)
    x = jnp.stack([h_cell, h_info], axis=1)                     # (B, 2, H)
    Q = jnp.einsum("bth,oh->bto", x, p["wq"])
    K = jnp.einsum("bth,oh->bto", x, p["wk"])
    V = jnp.einsum("bth,oh->bto", x, p["wv"])
    dim = x.shape[-1]
    a = jnp.sum(Q * K, -1) / jnp.sqrt(jnp.float32(dim))         # (B, 2)
    a = jax.nn.softmax(a, axis=1)
    x_att = jnp.sum(a[..., None] * V, axis=1)                   # (B, H)
    out_cell = lin(x_att, p["w_oc"], p["b_oc"])
    out_site = jax.nn.sigmoid(lin(h_site, p["w_os"], p["b_os"]))
    return out_cell, out_site


# ----------------------------------------------------------------------------
# Deterministic parameter init (shapes mirror the nn.Linear layers of AITTM)
# ----------------------------------------------------------------------------
def init_params(key, i_dim, r=2, c=5):
    H = i_dim // r
    ks = jax.random.split(key, 13)

    def u(k, shape, fan_in):
        lim = 1.0 / jnp.sqrt(jnp.float32(fan_in))
        return jax.random.uniform(k, shape, jnp.float32, -lim, lim)

    return {
        "w_cell": u(ks[0], (H, i_dim), i_dim), "b_cell": u(ks[1], (H,), i_dim),
        "w_site": u(ks[2], (H, i_dim), i_dim), "b_site": u(ks[3], (H,), i_dim),
        "w_info": u(ks[4], (H, H), H),         "b_info": u(ks[5], (H,), H),
        "wq": u(ks[6], (H, H), H),
        "wk": u(ks[7], (H, H), H),
        "wv": u(ks[8], (H, H), H),
        "w_oc": u(ks[9], (c, H), H),  "b_oc": u(ks[10], (c,), H),
        "w_os": u(ks[11], (1, H), H), "b_os": u(ks[12], (1,), H),
    }


if __name__ == "__main__":
    key = jax.random.PRNGKey(0)
    B, i_dim, r, c = 2, 32, 2, 5
    kc, ks, kp = jax.random.split(key, 3)
    x_cell = jax.random.normal(kc, (B, i_dim), jnp.float32)
    x_site = jax.random.normal(ks, (B, i_dim), jnp.float32)
    params = init_params(kp, i_dim, r, c)

    out_cell, out_site = jax.block_until_ready(aittm_forward(x_cell, x_site, params))
    ref_cell, ref_site = ref_aittm(x_cell, x_site, params)

    assert out_cell.shape == (B, c), out_cell.shape
    assert out_site.shape == (B, 1), out_site.shape
    assert jnp.allclose(out_cell, ref_cell, rtol=1e-3, atol=1e-4), \
        float(jnp.max(jnp.abs(out_cell - ref_cell)))
    assert jnp.allclose(out_site, ref_site, rtol=1e-3, atol=1e-4), \
        float(jnp.max(jnp.abs(out_site - ref_site)))

    print("KERNEL_OK")
</pallas_src>

<mosaic_0001>
module attributes {stable_mosaic.version = 11 : i64} {
  func.func @aittm_kernel(%arg0: i32, %arg1: memref<2x32xf32, #tpu.memory_space<vmem>>, %arg2: memref<2x32xf32, #tpu.memory_space<vmem>>, %arg3: memref<32x128xf32, #tpu.memory_space<vmem>>, %arg4: memref<1x128xf32, #tpu.memory_space<vmem>>, %arg5: memref<32x128xf32, #tpu.memory_space<vmem>>, %arg6: memref<1x128xf32, #tpu.memory_space<vmem>>, %arg7: memref<128x128xf32, #tpu.memory_space<vmem>>, %arg8: memref<1x128xf32, #tpu.memory_space<vmem>>, %arg9: memref<128x384xf32, #tpu.memory_space<vmem>>, %arg10: memref<128x128xf32, #tpu.memory_space<vmem>>, %arg11: memref<128x128xf32, #tpu.memory_space<vmem>>, %arg12: memref<1x128xf32, #tpu.memory_space<vmem>>, %arg13: memref<2x128xf32, #tpu.memory_space<vmem>>) attributes {dimension_semantics = [#tpu.dimension_semantics<parallel>], iteration_bounds = array<i64: 1>, scalar_prefetch = 0 : i64, scratch_operands = 0 : i64, tpu.core_type = #tpu.core_type<tc>, window_params = [{transform_indices = @transform_0, window_bounds = array<i64: 2, 32>}, {transform_indices = @transform_1, window_bounds = array<i64: 2, 32>}, {pipeline_mode = #tpu.pipeline_mode<synchronous>, transform_indices = @transform_2, window_bounds = array<i64: 32, 128>}, {pipeline_mode = #tpu.pipeline_mode<synchronous>, transform_indices = @transform_3, window_bounds = array<i64: 1, 128>}, {pipeline_mode = #tpu.pipeline_mode<synchronous>, transform_indices = @transform_4, window_bounds = array<i64: 32, 128>}, {pipeline_mode = #tpu.pipeline_mode<synchronous>, transform_indices = @transform_5, window_bounds = array<i64: 1, 128>}, {pipeline_mode = #tpu.pipeline_mode<synchronous>, transform_indices = @transform_6, window_bounds = array<i64: 128, 128>}, {pipeline_mode = #tpu.pipeline_mode<synchronous>, transform_indices = @transform_7, window_bounds = array<i64: 1, 128>}, {pipeline_mode = #tpu.pipeline_mode<synchronous>, transform_indices = @transform_8, window_bounds = array<i64: 128, 384>}, {pipeline_mode = #tpu.pipeline_mode<synchronous>, transform_indices = @transform_9, window_bounds = array<i64: 128, 128>}, {pipeline_mode = #tpu.pipeline_mode<synchronous>, transform_indices = @transform_10, window_bounds = array<i64: 128, 128>}, {pipeline_mode = #tpu.pipeline_mode<synchronous>, transform_indices = @transform_11, window_bounds = array<i64: 1, 128>}, {transform_indices = @transform_12, window_bounds = array<i64: 2, 128>}]} {
    %c0 = arith.constant 0 : index
    %c0_0 = arith.constant 0 : index
    %0 = vector.load %arg1[%c0, %c0_0] : memref<2x32xf32, #tpu.memory_space<vmem>>, vector<2x32xf32>
    %c0_1 = arith.constant 0 : index
    %c0_2 = arith.constant 0 : index
    %1 = vector.load %arg2[%c0_1, %c0_2] : memref<2x32xf32, #tpu.memory_space<vmem>>, vector<2x32xf32>
    %c0_3 = arith.constant 0 : index
    %c0_4 = arith.constant 0 : index
    %2 = vector.load %arg5[%c0_3, %c0_4] : memref<32x128xf32, #tpu.memory_space<vmem>>, vector<32x128xf32>
    %cst = arith.constant dense<0.000000e+00> : vector<2x128xf32>
    %3 = tpu.matmul %1, %2, %cst {dimension_numbers = #tpu.dot_dimension_numbers<[1], [0], [0], [1], [0, 0, 1, 1], [], []>} : vector<2x32xf32>, vector<32x128xf32>, vector<2x128xf32> -> vector<2x128xf32>
    %c0_5 = arith.constant 0 : index
    %c0_6 = arith.constant 0 : index
    %4 = vector.load %arg6[%c0_5, %c0_6] : memref<1x128xf32, #tpu.memory_space<vmem>>, vector<1x128xf32>
    %5 = vector.broadcast %4 : vector<1x128xf32> to vector<2x128xf32>
    %6 = arith.addf %3, %5 : vector<2x128xf32>
    %cst_7 = arith.constant 0.000000e+00 : f32
    %7 = vector.broadcast %cst_7 : f32 to vector<2x128xf32>
    %8 = arith.maximumf %6, %7 : vector<2x128xf32>
    %c0_8 = arith.constant 0 : index
    %c0_9 = arith.constant 0 : index
    %9 = vector.load %arg3[%c0_8, %c0_9] : memref<32x128xf32, #tpu.memory_space<vmem>>, vector<32x128xf32>
    %cst_10 = arith.constant dense<0.000000e+00> : vector<2x128xf32>
    %10 = tpu.matmul %0, %9, %cst_10 {dimension_numbers = #tpu.dot_dimension_numbers<[1], [0], [0], [1], [0, 0, 1, 1], [], []>} : vector<2x32xf32>, vector<32x128xf32>, vector<2x128xf32> -> vector<2x128xf32>
    %c0_11 = arith.constant 0 : index
    %c0_12 = arith.constant 0 : index
    %11 = vector.load %arg4[%c0_11, %c0_12] : memref<1x128xf32, #tpu.memory_space<vmem>>, vector<1x128xf32>
    %12 = vector.broadcast %11 : vector<1x128xf32> to vector<2x128xf32>
    %13 = arith.addf %10, %12 : vector<2x128xf32>
    %cst_13 = arith.constant 0.000000e+00 : f32
    %14 = vector.broadcast %cst_13 : f32 to vector<2x128xf32>
    %15 = arith.maximumf %13, %14 : vector<2x128xf32>
    %c0_14 = arith.constant 0 : index
    %c0_15 = arith.constant 0 : index
    %16 = vector.load %arg7[%c0_14, %c0_15] : memref<128x128xf32, #tpu.memory_space<vmem>>, vector<128x128xf32>
    %cst_16 = arith.constant dense<0.000000e+00> : vector<2x128xf32>
    %17 = tpu.matmul %8, %16, %cst_16 {dimension_numbers = #tpu.dot_dimension_numbers<[1], [0], [0], [1], [0, 0, 1, 1], [], []>} : vector<2x128xf32>, vector<128x128xf32>, vector<2x128xf32> -> vector<2x128xf32>
    %c0_17 = arith.constant 0 : index
    %c0_18 = arith.constant 0 : index
    %18 = vector.load %arg8[%c0_17, %c0_18] : memref<1x128xf32, #tpu.memory_space<vmem>>, vector<1x128xf32>
    %19 = vector.broadcast %18 : vector<1x128xf32> to vector<2x128xf32>
    %20 = arith.addf %17, %19 : vector<2x128xf32>
    %cst_19 = arith.constant 0.000000e+00 : f32
    %21 = vector.broadcast %cst_19 : f32 to vector<2x128xf32>
    %22 = arith.maximumf %20, %21 : vector<2x128xf32>
    %c0_20 = arith.constant 0 : index
    %c0_21 = arith.constant 0 : index
    %23 = vector.load %arg9[%c0_20, %c0_21] : memref<128x384xf32, #tpu.memory_space<vmem>>, vector<128x384xf32>
    %cst_22 = arith.constant dense<0.000000e+00> : vector<2x384xf32>
    %24 = tpu.matmul %15, %23, %cst_22 {dimension_numbers = #tpu.dot_dimension_numbers<[1], [0], [0], [1], [0, 0, 1, 1], [], []>} : vector<2x128xf32>, vector<128x384xf32>, vector<2x384xf32> -> vector<2x384xf32>
    %c0_23 = arith.constant 0 : index
    %c0_24 = arith.constant 0 : index
    %25 = vector.load %arg9[%c0_23, %c0_24] : memref<128x384xf32, #tpu.memory_space<vmem>>, vector<128x384xf32>
    %cst_25 = arith.constant dense<0.000000e+00> : vector<2x384xf32>
    %26 = tpu.matmul %22, %25, %cst_25 {dimension_numbers = #tpu.dot_dimension_numbers<[1], [0], [0], [1], [0, 0, 1, 1], [], []>} : vector<2x128xf32>, vector<128x384xf32>, vector<2x384xf32> -> vector<2x384xf32>
    %27 = vector.extract_strided_slice %24 {offsets = [0, 0], sizes = [2, 128], strides = [1, 1]} : vector<2x384xf32> to vector<2x128xf32>
    %28 = vector.extract_strided_slice %24 {offsets = [0, 128], sizes = [2, 128], strides = [1, 1]} : vector<2x384xf32> to vector<2x128xf32>
    %29 = vector.extract_strided_slice %24 {offsets = [0, 256], sizes = [2, 128], strides = [1, 1]} : vector<2x384xf32> to vector<2x128xf32>
    %30 = vector.extract_strided_slice %26 {offsets = [0, 0], sizes = [2, 128], strides = [1, 1]} : vector<2x384xf32> to vector<2x128xf32>
    %31 = vector.extract_strided_slice %26 {offsets = [0, 128], sizes = [2, 128], strides = [1, 1]} : vector<2x384xf32> to vector<2x128xf32>
    %32 = vector.extract_strided_slice %26 {offsets = [0, 256], sizes = [2, 128], strides = [1, 1]} : vector<2x384xf32> to vector<2x128xf32>
    %33 = arith.mulf %27, %28 : vector<2x128xf32>
    %cst_26 = arith.constant dense<0.000000e+00> : vector<2xf32>
    %34 = vector.multi_reduction <add>, %33, %cst_26 [1] : vector<2x128xf32> to vector<2xf32>
    %35 = vector.shape_cast %34 : vector<2xf32> to vector<2x1xf32>
    %cst_27 = arith.constant 2.500000e-01 : f32
    %36 = vector.broadcast %cst_27 : f32 to vector<2x1xf32>
    %37 = arith.mulf %35, %36 : vector<2x1xf32>
    %38 = arith.mulf %30, %31 : vector<2x128xf32>
    %cst_28 = arith.constant dense<0.000000e+00> : vector<2xf32>
    %39 = vector.multi_reduction <add>, %38, %cst_28 [1] : vector<2x128xf32> to vector<2xf32>
    %40 = vector.shape_cast %39 : vector<2xf32> to vector<2x1xf32>
    %cst_29 = arith.constant 2.500000e-01 : f32
    %41 = vector.broadcast %cst_29 : f32 to vector<2x1xf32>
    %42 = arith.mulf %40, %41 : vector<2x1xf32>
    %43 = arith.maximumf %37, %42 : vector<2x1xf32>
    %44 = arith.subf %37, %43 : vector<2x1xf32>
    %45 = math.exp %44 : vector<2x1xf32>
    %46 = arith.subf %42, %43 : vector<2x1xf32>
    %47 = math.exp %46 : vector<2x1xf32>
    %48 = arith.addf %45, %47 : vector<2x1xf32>
    %49 = tpu.reciprocal %48 {approx = true} : vector<2x1xf32> -> vector<2x1xf32>
    %50 = arith.mulf %48, %49 : vector<2x1xf32>
    %cst_30 = arith.constant 2.000000e+00 : f32
    %51 = vector.broadcast %cst_30 : f32 to vector<2x1xf32>
    %52 = arith.subf %51, %50 : vector<2x1xf32>
    %53 = arith.mulf %49, %52 : vector<2x1xf32>
    %54 = arith.mulf %45, %53 : vector<2x1xf32>
    %55 = vector.broadcast %54 : vector<2x1xf32> to vector<2x128xf32>
    %56 = arith.mulf %55, %29 : vector<2x128xf32>
    %57 = arith.mulf %47, %53 : vector<2x1xf32>
    %58 = vector.broadcast %57 : vector<2x1xf32> to vector<2x128xf32>
    %59 = arith.mulf %58, %32 : vector<2x128xf32>
    %60 = arith.addf %56, %59 : vector<2x128xf32>
    %c0_31 = arith.constant 0 : index
    %c0_32 = arith.constant 0 : index
    %61 = vector.load %arg10[%c0_31, %c0_32] : memref<128x128xf32, #tpu.memory_space<vmem>>, vector<128x128xf32>
    %cst_33 = arith.constant dense<0.000000e+00> : vector<2x128xf32>
    %62 = tpu.matmul %60, %61, %cst_33 {dimension_numbers = #tpu.dot_dimension_numbers<[1], [0], [0], [1], [0, 0, 1, 1], [], []>} : vector<2x128xf32>, vector<128x128xf32>, vector<2x128xf32> -> vector<2x128xf32>
    %c0_34 = arith.constant 0 : index
    %c0_35 = arith.constant 0 : index
    %63 = vector.load %arg11[%c0_34, %c0_35] : memref<128x128xf32, #tpu.memory_space<vmem>>, vector<128x128xf32>
    %cst_36 = arith.constant dense<0.000000e+00> : vector<2x128xf32>
    %64 = tpu.matmul %8, %63, %cst_36 {dimension_numbers = #tpu.dot_dimension_numbers<[1], [0], [0], [1], [0, 0, 1, 1], [], []>} : vector<2x128xf32>, vector<128x128xf32>, vector<2x128xf32> -> vector<2x128xf32>
    %65 = arith.addf %62, %64 : vector<2x128xf32>
    %c0_37 = arith.constant 0 : index
    %c0_38 = arith.constant 0 : index
    %66 = vector.load %arg12[%c0_37, %c0_38] : memref<1x128xf32, #tpu.memory_space<vmem>>, vector<1x128xf32>
    %67 = vector.broadcast %66 : vector<1x128xf32> to vector<2x128xf32>
    %68 = arith.addf %65, %67 : vector<2x128xf32>
    %69 = tpu.iota {dimensions = array<i32: 1>} : vector<2x128xi32>
    %c5_i32 = arith.constant 5 : i32
    %70 = vector.broadcast %c5_i32 : i32 to vector<2x128xi32>
    %71 = arith.cmpi eq, %69, %70 : vector<2x128xi32>
    %72 = arith.negf %68 : vector<2x128xf32>
    %73 = math.exp %72 : vector<2x128xf32>
    %cst_39 = arith.constant 1.000000e+00 : f32
    %74 = vector.broadcast %cst_39 : f32 to vector<2x128xf32>
    %75 = arith.addf %74, %73 : vector<2x128xf32>
    %76 = arith.divf %74, %75 : vector<2x128xf32>
    %77 = arith.select %71, %76, %68 : vector<2x128xi1>, vector<2x128xf32>
    %c0_40 = arith.constant 0 : index
    %c0_41 = arith.constant 0 : index
    %78 = vector.load %arg13[%c0_40, %c0_41] : memref<2x128xf32, #tpu.memory_space<vmem>>, vector<2x128xf32>
    tpu.vector_store %arg13[%c0_40, %c0_41], %77 {strides = array<i32>} : memref<2x128xf32, #tpu.memory_space<vmem>>, vector<2x128xf32>,
    return
  }
  func.func @transform_0(%arg0: i32) -> (i32, i32) {
    %c0_i32 = arith.constant 0 : i32
    %c0_i32_0 = arith.constant 0 : i32
    return %arg0, %c0_i32 : i32, i32
  }
  func.func @transform_1(%arg0: i32) -> (i32, i32) {
    %c0_i32 = arith.constant 0 : i32
    %c0_i32_0 = arith.constant 0 : i32
    return %arg0, %c0_i32 : i32, i32
  }
  func.func @transform_2(%arg0: i32) -> (i32, i32) {
    %c0_i32 = arith.constant 0 : i32
    %c0_i32_0 = arith.constant 0 : i32
    %c0_i32_1 = arith.constant 0 : i32
    return %c0_i32, %c0_i32_0 : i32, i32
  }
  func.func @transform_3(%arg0: i32) -> (i32, i32) {
    %c0_i32 = arith.constant 0 : i32
    %c0_i32_0 = arith.constant 0 : i32
    %c0_i32_1 = arith.constant 0 : i32
    return %c0_i32, %c0_i32_0 : i32, i32
  }
  func.func @transform_4(%arg0: i32) -> (i32, i32) {
    %c0_i32 = arith.constant 0 : i32
    %c0_i32_0 = arith.constant 0 : i32
    %c0_i32_1 = arith.constant 0 : i32
    return %c0_i32, %c0_i32_0 : i32, i32
  }
  func.func @transform_5(%arg0: i32) -> (i32, i32) {
    %c0_i32 = arith.constant 0 : i32
    %c0_i32_0 = arith.constant 0 : i32
    %c0_i32_1 = arith.constant 0 : i32
    return %c0_i32, %c0_i32_0 : i32, i32
  }
  func.func @transform_6(%arg0: i32) -> (i32, i32) {
    %c0_i32 = arith.constant 0 : i32
    %c0_i32_0 = arith.constant 0 : i32
    %c0_i32_1 = arith.constant 0 : i32
    return %c0_i32, %c0_i32_0 : i32, i32
  }
  func.func @transform_7(%arg0: i32) -> (i32, i32) {
    %c0_i32 = arith.constant 0 : i32
    %c0_i32_0 = arith.constant 0 : i32
    %c0_i32_1 = arith.constant 0 : i32
    return %c0_i32, %c0_i32_0 : i32, i32
  }
  func.func @transform_8(%arg0: i32) -> (i32, i32) {
    %c0_i32 = arith.constant 0 : i32
    %c0_i32_0 = arith.constant 0 : i32
    %c0_i32_1 = arith.constant 0 : i32
    return %c0_i32, %c0_i32_0 : i32, i32
  }
  func.func @transform_9(%arg0: i32) -> (i32, i32) {
    %c0_i32 = arith.constant 0 : i32
    %c0_i32_0 = arith.constant 0 : i32
    %c0_i32_1 = arith.constant 0 : i32
    return %c0_i32, %c0_i32_0 : i32, i32
  }
  func.func @transform_10(%arg0: i32) -> (i32, i32) {
    %c0_i32 = arith.constant 0 : i32
    %c0_i32_0 = arith.constant 0 : i32
    %c0_i32_1 = arith.constant 0 : i32
    return %c0_i32, %c0_i32_0 : i32, i32
  }
  func.func @transform_11(%arg0: i32) -> (i32, i32) {
    %c0_i32 = arith.constant 0 : i32
    %c0_i32_0 = arith.constant 0 : i32
    %c0_i32_1 = arith.constant 0 : i32
    return %c0_i32, %c0_i32_0 : i32, i32
  }
  func.func @transform_12(%arg0: i32) -> (i32, i32) {
    %c0_i32 = arith.constant 0 : i32
    %c0_i32_0 = arith.constant 0 : i32
    return %arg0, %c0_i32 : i32, i32
  }
}

</mosaic_0001>

<bundles_post_ra>
// kernel: tpu_custom_call.1
= control target key start
LH: loop header
LB: loop body
LE: loop exit
PB: predicated region body
PF: predicated region fallthrough
CT: control target
= control target key end

     0   :  { %17 = vsyncpa [#allocation3], 0  ;;  %s2021_s0 = inlined_call_operand.hbm [shape: f32[2,32], index: 0, kind: input, shape index: {}]   ;;  %s2022_s1 = inlined_call_operand.vmem [shape: f32[2,32], index: 1, kind: input, shape index: {}]   ;;  %s2023_s2 = inlined_call_operand.hbm [shape: f32[32,128], index: 2, kind: input, shape index: {}]   ;;  %s2024_s3 = inlined_call_operand.vmem [shape: f32[1,128], index: 3, kind: input, shape index: {}]   ;;  %s2025_s4 = inlined_call_operand.hbm [shape: f32[32,128], index: 4, kind: input, shape index: {}]   ;;  %s2026_s5 = inlined_call_operand.vmem [shape: f32[1,128], index: 5, kind: input, shape index: {}]   ;;  %s2027_s6 = inlined_call_operand.hbm [shape: f32[128,128], index: 6, kind: input, shape index: {}]   ;;  %s2028_s7 = inlined_call_operand.vmem [shape: f32[1,128], index: 7, kind: input, shape index: {}]   ;;  %s2029_s8 = inlined_call_operand.hbm [shape: f32[128,384], index: 8, kind: input, shape index: {}]   ;;  %s2030_s9 = inlined_call_operand.hbm [shape: f32[128,128], index: 9, kind: input, shape index: {}]   ;;  %s2031_s10 = inlined_call_operand.hbm [shape: f32[128,128], index: 10, kind: input, shape index: {}]   ;;  %s2032_s11 = inlined_call_operand.vmem [shape: f32[1,128], index: 11, kind: input, shape index: {}]   ;;  %s2033_s12 = inlined_call_operand.hbm [shape: f32[2,128], index: 12, kind: output, shape index: {}]  }
   0x1   :  { %18 = vsyncpa [#allocation6], 0 }
   0x2   :  { %19 = vsyncpa [#allocation9], 0 }
   0x3   :  { %20 = vsyncpa [#allocation12], 0 }
   0x4   :  { %21 = vsyncpa [#allocation4], 0  ;;  %s1675_s21 = smov [#allocation5]   ;;  %s1489_s25 = scalar_lea.hbm %s2023_s2, 512 }
   0x5   :  { %s39_s22 = sshll.u32 %s1675_s21, 4  ;;  %p1490_p0 = scmp.ne.s32.totalorder %s2023_s2, %s1489_s25  ;;  %s40_s22 = int_to_ptr.vmem [resolvable:$true] %s39_s22 }
   0x6   :  { %p1493_p1 = scmp.lt.u32.totalorder %s1489_s25, %s2023_s2 }
   0x8   :  { %p1495_p2 = pnand %p1493_p1, %p1490_p0 }
   0xa   :  { %1498 = shalt.err (!%p1495_p2)
}
   0xb   :  { %s1499_s30 = scalar_lea.vmem %s40_s22, 512  ;;  %p1504_p4 = scmp.lt.s32.totalorder %s40_s22, %s40_s22 }
   0xc   :  { %p1500_p3 = scmp.ne.s32.totalorder %s40_s22, %s1499_s30  ;;  %p1505_p5 = scmp.lt.s32.totalorder %s1499_s30, %s1499_s30 }
   0xe   :  { %p1506_p6 = por %p1505_p5, %p1504_p4 }
  0x10   :  { %p1507_p7 = pnand %p1506_p6, %p1500_p3 }
  0x12   :  { %1510 = shalt.err (!%p1507_p7)
}
  0x13   :  { %s1676_s13 = smov 128   ;;  %s1677_s14 = smov 8  }
  0x14   :  { %45 = dma.hbm_to_vmem [thread:$0]  %s2023_s2, 512, %s40_s22, [#allocation6], %s1676_s13, %s1676_s13, %s1677_s14  }
  0x15   :  { %s1678_s17 = smov [#allocation8]   ;;  %s1679_s19 = smov [#allocation11]  }
  0x16   :  { %s67_s18 = sshll.u32 %s1678_s17, 4  ;;  %s93_s20 = sshll.u32 %s1679_s19, 4  ;;  %s68_s18 = int_to_ptr.vmem [resolvable:$true] %s67_s18  ;;  %s94_s20 = int_to_ptr.vmem [resolvable:$true] %s93_s20 }
  0x17   :  { %s1511_s24 = scalar_lea.hbm %s2027_s6, 2048 }
  0x18   :  { %p1512_p8 = scmp.ne.s32.totalorder %s2027_s6, %s1511_s24  ;;  %p1515_p9 = scmp.lt.u32.totalorder %s1511_s24, %s2027_s6 }
  0x1a   :  { %p1517_p10 = pnand %p1515_p9, %p1512_p8 }
  0x1c   :  { %1520 = shalt.err (!%p1517_p10)
}
  0x1d   :  { %s1521_s2 = scalar_lea.vmem %s68_s18, 2048  ;;  %p1526_p12 = scmp.lt.s32.totalorder %s68_s18, %s68_s18 }
  0x1e   :  { %p1522_p11 = scmp.ne.s32.totalorder %s68_s18, %s1521_s2  ;;  %p1527_p13 = scmp.lt.s32.totalorder %s1521_s2, %s1521_s2 }
  0x20   :  { %p1528_p0 = por %p1527_p13, %p1526_p12 }
  0x22   :  { %p1529_p1 = pnand %p1528_p0, %p1522_p11 }
  0x24   :  { %1532 = shalt.err (!%p1529_p1)
}
  0x25   :  { %73 = dma.hbm_to_vmem [thread:$0]  %s2027_s6, 2048, %s68_s18, [#allocation9], %s1676_s13, %s1676_s13, %s1677_s14  }
  0x26   :  { %s1533_s16 = scalar_lea.hbm %s2030_s9, 2048 }
  0x27   :  { %p1534_p2 = scmp.ne.s32.totalorder %s2030_s9, %s1533_s16  ;;  %p1537_p3 = scmp.lt.u32.totalorder %s1533_s16, %s2030_s9 }
  0x29   :  { %p1539_p4 = pnand %p1537_p3, %p1534_p2 }
  0x2b   :  { %1542 = shalt.err (!%p1539_p4)
}
  0x2c   :  { %s1543_s24 = scalar_lea.vmem %s94_s20, 2048  ;;  %p1548_p6 = scmp.lt.s32.totalorder %s94_s20, %s94_s20 }
  0x2d   :  { %p1544_p5 = scmp.ne.s32.totalorder %s94_s20, %s1543_s24  ;;  %p1549_p7 = scmp.lt.s32.totalorder %s1543_s24, %s1543_s24 }
  0x2f   :  { %p1550_p8 = por %p1549_p7, %p1548_p6 }
  0x31   :  { %p1551_p9 = pnand %p1550_p8, %p1544_p5 }
  0x33   :  { %1554 = shalt.err (!%p1551_p9)
}
  0x34   :  { %99 = dma.hbm_to_vmem [thread:$0]  %s2030_s9, 2048, %s94_s20, [#allocation12], %s1676_s13, %s1676_s13, %s1677_s14  }
  0x35   :  { %s1680_s25 = smov [#allocation2]   ;;  %s1681_s27 = smov [#allocation7]  }
  0x36   :  { %s28_s26 = sshll.u32 %s1680_s25, 4  ;;  %s53_s28 = sshll.u32 %s1681_s27, 4  ;;  %s29_s26 = int_to_ptr.vmem [resolvable:$true] %s28_s26  ;;  %s54_s28 = int_to_ptr.vmem [resolvable:$true] %s53_s28 }
  0x37   :  { %s1555_s29 = scalar_lea.hbm %s2021_s0, 32 }
  0x38   :  { %p1556_p10 = scmp.ne.s32.totalorder %s2021_s0, %s1555_s29  ;;  %p1559_p11 = scmp.lt.u32.totalorder %s1555_s29, %s2021_s0 }
  0x3a   :  { %p1561_p12 = pnand %p1559_p11, %p1556_p10 }
  0x3c   :  { %1564 = shalt.err (!%p1561_p12)
}
  0x3d   :  { %s1565_s9 = scalar_lea.vmem %s29_s26, 32  ;;  %p1570_p0 = scmp.lt.s32.totalorder %s29_s26, %s29_s26 }
  0x3e   :  { %p1566_p13 = scmp.ne.s32.totalorder %s29_s26, %s1565_s9  ;;  %p1571_p1 = scmp.lt.s32.totalorder %s1565_s9, %s1565_s9 }
  0x40   :  { %p1572_p2 = por %p1571_p1, %p1570_p0 }
  0x42   :  { %p1573_p3 = pnand %p1572_p2, %p1566_p13 }
  0x44   :  { %1576 = shalt.err (!%p1573_p3)
}
  0x45   :  { %31 = dma.hbm_to_vmem [thread:$0]  %s2021_s0, 32, %s29_s26, [#allocation3]  }
  0x46   :  { %s1577_s24 = scalar_lea.hbm %s2025_s4, 512 }
  0x47   :  { %p1578_p4 = scmp.ne.s32.totalorder %s2025_s4, %s1577_s24  ;;  %p1581_p5 = scmp.lt.u32.totalorder %s1577_s24, %s2025_s4 }
  0x49   :  { %p1583_p6 = pnand %p1581_p5, %p1578_p4 }
  0x4b   :  { %1586 = shalt.err (!%p1583_p6)
}
  0x4c   :  { %s1587_s2 = scalar_lea.vmem %s54_s28, 512  ;;  %p1592_p8 = scmp.lt.s32.totalorder %s54_s28, %s54_s28 }
  0x4d   :  { %p1588_p7 = scmp.ne.s32.totalorder %s54_s28, %s1587_s2  ;;  %p1593_p9 = scmp.lt.s32.totalorder %s1587_s2, %s1587_s2 }
  0x4f   :  { %p1594_p10 = por %p1593_p9, %p1592_p8 }
  0x51   :  { %p1595_p11 = pnand %p1594_p10, %p1588_p7 }
  0x53   :  { %1598 = shalt.err (!%p1595_p11)
}
  0x54   :  { %59 = dma.hbm_to_vmem [thread:$0]  %s2025_s4, 512, %s54_s28, [#allocation6], %s1676_s13, %s1676_s13, %s1677_s14  }
  0x55   :  { %s1682_s22 = smov [#allocation10]   ;;  %s1599_s16 = scalar_lea.hbm %s2029_s8, 6144 }
  0x56   :  { %s81_s29 = sshll.u32 %s1682_s22, 4  ;;  %p1600_p12 = scmp.ne.s32.totalorder %s2029_s8, %s1599_s16  ;;  %s82_s29 = int_to_ptr.vmem [resolvable:$true] %s81_s29 }
  0x57   :  { %p1603_p13 = scmp.lt.u32.totalorder %s1599_s16, %s2029_s8 }
  0x59   :  { %p1605_p0 = pnand %p1603_p13, %p1600_p12 }
  0x5b   :  { %1608 = shalt.err (!%p1605_p0)
}
  0x5c   :  { %s1609_s21 = scalar_lea.vmem %s82_s29, 6144  ;;  %p1614_p2 = scmp.lt.s32.totalorder %s82_s29, %s82_s29 }
  0x5d   :  { %p1610_p1 = scmp.ne.s32.totalorder %s82_s29, %s1609_s21  ;;  %p1615_p3 = scmp.lt.s32.totalorder %s1609_s21, %s1609_s21 }
  0x5f   :  { %p1616_p4 = por %p1615_p3, %p1614_p2 }
  0x61   :  { %p1617_p5 = pnand %p1616_p4, %p1610_p1 }
  0x63   :  { %1620 = shalt.err (!%p1617_p5)
}
  0x64   :  { %s1683_s4 = smov 384   ;;  %s1684_s28 = smov 24  }
  0x65   :  { %87 = dma.hbm_to_vmem [thread:$0]  %s2029_s8, 6144, %s82_s29, [#allocation9], %s1683_s4, %s1683_s4, %s1684_s28  }
  0x66   :  { %s1685_s6 = smov [#allocation13]   ;;  %s1621_s2 = scalar_lea.hbm %s2031_s10, 2048 }
  0x67   :  { %s105_s18 = sshll.u32 %s1685_s6, 4  ;;  %p1622_p6 = scmp.ne.s32.totalorder %s2031_s10, %s1621_s2  ;;  %s106_s18 = int_to_ptr.vmem [resolvable:$true] %s105_s18 }
  0x68   :  { %p1625_p7 = scmp.lt.u32.totalorder %s1621_s2, %s2031_s10 }
  0x6a   :  { %p1627_p8 = pnand %p1625_p7, %p1622_p6 }
  0x6c   :  { %1630 = shalt.err (!%p1627_p8)
}
  0x6d   :  { %s1631_s15 = scalar_lea.vmem %s106_s18, 2048  ;;  %p1636_p10 = scmp.lt.s32.totalorder %s106_s18, %s106_s18 }
  0x6e   :  { %p1632_p9 = scmp.ne.s32.totalorder %s106_s18, %s1631_s15  ;;  %p1637_p11 = scmp.lt.s32.totalorder %s1631_s15, %s1631_s15 }
  0x70   :  { %p1638_p12 = por %p1637_p11, %p1636_p10 }
  0x72   :  { %p1639_p13 = pnand %p1638_p12, %p1632_p9 }
  0x74   :  { %1642 = shalt.err (!%p1639_p13)
}
  0x75   :  { %111 = dma.hbm_to_vmem [thread:$0]  %s2031_s10, 2048, %s106_s18, [#allocation12], %s1676_s13, %s1676_s13, %s1677_s14  }
  0x76   :  { %1665 = dma.done.wait [#allocation3], 32  }
  0x77   :  { %1666 = vsyncadd [#allocation3], 4294967264 }
  0x78   :  { %1667 = dma.done.wait [#allocation6], 1024  }
  0x79   :  { %1668 = vsyncadd [#allocation6], 4294966272 }
  0x7a   :  { %1669 = dma.done.wait [#allocation9], 8192  }
  0x7b   :  { %1670 = vsyncadd [#allocation9], 4294959104 }
  0x7c   :  { %1671 = dma.done.wait [#allocation12], 4096  }
  0x7d   :  { %1672 = vsyncadd [#allocation12], 4294963200  ;;  %v1686_v0 = vmov 0.0|0.0   ;;  %vm1687_vm0 = vmmov 0   ;;  %v1688_v1 = vmov 0.0   ;;  %v137_v2 = vld [vmem:[#allocation7] sm:$0xff] }
  0x7e   :  { %1268 = vmatprep.subr.bf16.mxu1 %v1686_v0  ;;  %1079 = vmatprep.mubr.msk.f32.mxu1 %vm1687_vm0, %v1688_v1  ;;  %v138_v3 = vld [vmem:[#allocation7 + $0x8] sm:$0xff]  ;;  %v139_v4 = vld [vmem:[#allocation7 + $0x10] sm:$0xff]  ;;  %v140_v6 = vld [vmem:[#allocation7 + $0x18] sm:$0xff]  ;;  %vm148_vm1 = vcmask 261120   ;;  %vm733_vm2 = vcmask 1041408   ;;  %s1689_s20 = smov [#allocation14]  }
  0x7f   :  { %1280 = vmatprep.subr.bf16.mxu0 %v1686_v0  ;;  %1125 = vmatprep.mubr.msk.f32.mxu0 %vm1687_vm0, %v1688_v1  ;;  %v1269_v5 = vpack.c.bf16 %v138_v3, %v137_v2  ;;  %v1272_v7 = vpack.c.bf16 %v140_v6, %v139_v4  ;;  %v223_v8 = vld [vmem:[#allocation5] sm:$0xff]  ;;  %v309_v10 = vld [vmem:[#allocation8 + $0x8] sm:$0xff]  ;;  %v310_v13 = vld [vmem:[#allocation8 + $0x10] sm:$0xff]  ;;  %s957_s19 = sshll.u32 %s1689_s20, 4  ;;  %s958_s19 = int_to_ptr.vmem [resolvable:$true] %s957_s19 }
  0x80   :  { %v308_v9 = vld [vmem:[#allocation8] sm:$0xff]  ;;  %v224_v11 = vld [vmem:[#allocation5 + $0x8] sm:$0xff]  ;;  %v311_v14 = vld [vmem:[#allocation8 + $0x18] sm:$0xff]  ;;  %s1643_s21 = scalar_lea.vmem %s958_s19, 32  ;;  %p1648_p1 = scmp.lt.s32.totalorder %s958_s19, %s958_s19 }
  0x81   :  { %1270 = vmatpush3.bf16.msra.mxu1 %v1269_v5  ;;  %v1281_v12 = vpack.c.bf16 %v309_v10, %v308_v9  ;;  %v1284_v15 = vpack.c.bf16 %v311_v14, %v310_v13  ;;  %v136_v16 = vld [vmem:[%s2022_s1] sm:$0x3]  ;;  %v1275_v17 = vpack.c.bf16 %v224_v11, %v223_v8  ;;  %v312_v18 = vld [vmem:[#allocation8 + $0x20] sm:$0xff]  ;;  %v313_v19 = vld [vmem:[#allocation8 + $0x28] sm:$0xff]  ;;  %p1644_p0 = scmp.ne.s32.totalorder %s958_s19, %s1643_s21  ;;  %p1649_p2 = scmp.lt.s32.totalorder %s1643_s21, %s1643_s21 }
  0x82   :  { %1271 = vmatprep.subr.bf16.mxu1 %v1686_v0  ;;  %v225_v20 = vld [vmem:[#allocation5 + $0x10] sm:$0xff]  ;;  %v226_v21 = vld [vmem:[#allocation5 + $0x18] sm:$0xff]  ;;  %v1287_v22 = vpack.c.bf16 %v313_v19, %v312_v18  ;;  %v316_v28 = vld [vmem:[#allocation8 + $0x40] sm:$0xff] }
  0x83   :  { %1282 = vmatpush3.bf16.msra.mxu0 %v1281_v12  ;;  %v1278_v23 = vpack.c.bf16 %v226_v21, %v225_v20  ;;  %v314_v24 = vld [vmem:[#allocation8 + $0x30] sm:$0xff]  ;;  %v315_v25 = vld [vmem:[#allocation8 + $0x38] sm:$0xff]  ;;  %v317_v29 = vld [vmem:[#allocation8 + $0x48] sm:$0xff]  ;;  %p1650_p3 = por %p1649_p2, %p1648_p1 }
  0x84   :  { %1283 = vmatprep.subr.bf16.mxu0 %v1686_v0  ;;  %v1290_v26 = vpack.c.bf16 %v315_v25, %v314_v24  ;;  %v135_v27 = vld [vmem:[#allocation2] sm:$0x3]  ;;  %v1293_v30 = vpack.c.bf16 %v317_v29, %v316_v28  ;;  %v318_v31 = vld [vmem:[#allocation8 + $0x50] sm:$0xff]  ;;  %v320_v34 = vld [vmem:[#allocation8 + $0x60] sm:$0xff] }
  0x85   :  { %1273 = vmatpush3.bf16.msra.mxu1 %v1272_v7  ;;  %v319_v32 = vld [vmem:[#allocation8 + $0x58] sm:$0xff]  ;;  %v321_v35 = vld [vmem:[#allocation8 + $0x68] sm:$0xff]  ;;  %v322_v37 = vld [vmem:[#allocation8 + $0x70] sm:$0xff]  ;;  %p1651_p4 = pnand %p1650_p3, %p1644_p0 }
  0x86   :  { %1274 = vmatprep.subr.bf16.mxu1 %v1686_v0  ;;  %v1296_v33 = vpack.c.bf16 %v319_v32, %v318_v31  ;;  %v1299_v36 = vpack.c.bf16 %v321_v35, %v320_v34  ;;  %v323_v38 = vld [vmem:[#allocation8 + $0x78] sm:$0xff]  ;;  %v403_v40 = vld [vmem:[#allocation10 + $0x8] sm:$0xff]  ;;  %v406_v41 = vld [vmem:[#allocation10 + $0x20] sm:$0xff] }
  0x87   :  { %1285 = vmatpush3.bf16.msra.mxu0 %v1284_v15  ;;  %v1302_v39 = vpack.c.bf16 %v323_v38, %v322_v37  ;;  %v402_v42 = vld [vmem:[#allocation10] sm:$0xff]  ;;  %v1304_v43 = vpack.c.bf16 %v406_v41, %v403_v40  ;;  %v405_v44 = vld [vmem:[#allocation10 + $0x18] sm:$0xff]  ;;  %v412_v47 = vld [vmem:[#allocation10 + $0x50] sm:$0xff] }
  0x88   :  { %1080 = vmatmul.mubr.msk.f32.vlgmr.msra.gmra.mrb[0].mxu1 %vm148_vm1, %v136_v16  ;;  %1286 = vmatprep.subr.bf16.mxu0 %v1686_v0  ;;  %v1879_v45 = vpack.c.bf16 %v405_v44, %v402_v42  ;;  %v409_v46 = vld [vmem:[#allocation10 + $0x38] sm:$0xff]  ;;  %v408_v48 = vld [vmem:[#allocation10 + $0x30] sm:$0xff]  ;;  %v411_v50 = vld [vmem:[#allocation10 + $0x48] sm:$0xff] }
  0x89   :  { %1276 = vmatpush3.bf16.msra.mxu1 %v1275_v17  ;;  %1090 = vmatprep.mubr.msk.f32.mxu1 %vm1687_vm0, %v1688_v1  ;;  %v1881_v49 = vpack.c.bf16 %v412_v47, %v409_v46  ;;  %v1884_v51 = vpack.c.bf16 %v411_v50, %v408_v48  ;;  %v415_v52 = vld [vmem:[#allocation10 + $0x68] sm:$0xff]  ;;  %v418_v53 = vld [vmem:[#allocation10 + $0x80] sm:$0xff]  ;;  %v417_v56 = vld [vmem:[#allocation10 + $0x78] sm:$0xff] }
  0x8a   :  { %1277 = vmatprep.subr.bf16.mxu1 %v1686_v0  ;;  %v414_v54 = vld [vmem:[#allocation10 + $0x60] sm:$0xff]  ;;  %v1887_v55 = vpack.c.bf16 %v418_v53, %v415_v52  ;;  %v421_v58 = vld [vmem:[#allocation10 + $0x98] sm:$0xff]  ;;  %v424_v59 = vld [vmem:[#allocation10 + $0xb0] sm:$0xff] }
  0x8b   :  { %1288 = vmatpush3.bf16.msra.mxu0 %v1287_v22  ;;  %v1890_v57 = vpack.c.bf16 %v417_v56, %v414_v54  ;;  %v420_v60 = vld [vmem:[#allocation10 + $0x90] sm:$0xff]  ;;  %v1893_v61 = vpack.c.bf16 %v424_v59, %v421_v58  ;;  %v423_v62 = vld [vmem:[#allocation10 + $0xa8] sm:$0xff]  ;;  %v430_v3 = vld [vmem:[#allocation10 + $0xe0] sm:$0xff] }
  0x8c   :  { %1289 = vmatprep.subr.bf16.mxu0 %v1686_v0  ;;  %v1896_v63 = vpack.c.bf16 %v423_v62, %v420_v60  ;;  %v427_v2 = vld [vmem:[#allocation10 + $0xc8] sm:$0xff]  ;;  %v426_v4 = vld [vmem:[#allocation10 + $0xc0] sm:$0xff]  ;;  %v429_v6 = vld [vmem:[#allocation10 + $0xd8] sm:$0xff] }
  0x8d   :  { %1279 = vmatpush3.bf16.msra.mxu1 %v1278_v23  ;;  %v1899_v5 = vpack.c.bf16 %v430_v3, %v427_v2  ;;  %v1902_v7 = vpack.c.bf16 %v429_v6, %v426_v4  ;;  %v433_v8 = vld [vmem:[#allocation10 + $0xf8] sm:$0xff]  ;;  %v436_v9 = vld [vmem:[#allocation10 + $0x110] sm:$0xff]  ;;  %v435_v12 = vld [vmem:[#allocation10 + $0x108] sm:$0xff] }
  0x8e   :  { %1305 = vmatprep.subr.bf16.mxu1 %v1304_v43  ;;  %v432_v10 = vld [vmem:[#allocation10 + $0xf0] sm:$0xff]  ;;  %v1905_v11 = vpack.c.bf16 %v436_v9, %v433_v8  ;;  %v439_v14 = vld [vmem:[#allocation10 + $0x128] sm:$0xff]  ;;  %v442_v15 = vld [vmem:[#allocation10 + $0x140] sm:$0xff] }
  0x8f   :  { %1291 = vmatpush3.bf16.msra.mxu0 %v1290_v26  ;;  %v1908_v13 = vpack.c.bf16 %v435_v12, %v432_v10  ;;  %v438_v16 = vld [vmem:[#allocation10 + $0x120] sm:$0xff]  ;;  %v1911_v17 = vpack.c.bf16 %v442_v15, %v439_v14  ;;  %v441_v18 = vld [vmem:[#allocation10 + $0x138] sm:$0xff]  ;;  %v448_v21 = vld [vmem:[#allocation10 + $0x170] sm:$0xff] }
  0x90   :  { %1091 = vmatmul.mubr.msk.f32.vlgmr.msra.gmra.mrb[2].mxu1 %vm148_vm1, %v135_v27  ;;  %1292 = vmatprep.subr.bf16.mxu0 %v1686_v0  ;;  %v1914_v19 = vpack.c.bf16 %v441_v18, %v438_v16  ;;  %v445_v20 = vld [vmem:[#allocation10 + $0x158] sm:$0xff]  ;;  %v444_v23 = vld [vmem:[#allocation10 + $0x150] sm:$0xff]  ;;  %v447_v24 = vld [vmem:[#allocation10 + $0x168] sm:$0xff] }
  0x91   :  { %514 = vmatprep.mubr.f32.mxu1 %v1688_v1  ;;  %1307 = vmatpush1.bf16.msra.mxu1 %v1879_v45  ;;  %v1917_v22 = vpack.c.bf16 %v448_v21, %v445_v20  ;;  %v1920_v25 = vpack.c.bf16 %v447_v24, %v444_v23  ;;  %v969_v26 = vld [vmem:[%s2026_s5] ss:$0 sm:$0xff]  ;;  %v404_v27 = vld [vmem:[#allocation10 + $0x10] sm:$0xff]  ;;  %v407_v28 = vld [vmem:[#allocation10 + $0x28] sm:$0xff] }
  0x92   :  { %1309 = vmatprep.subr.bf16.mxu1 %v1881_v49  ;;  %v1337_v32 = vpack.c.bf16 %v407_v28, %v404_v27  ;;  %v410_v34 = vld [vmem:[#allocation10 + $0x40] sm:$0xff]  ;;  %v413_v35 = vld [vmem:[#allocation10 + $0x58] sm:$0xff]  ;;  %v416_v38 = vld [vmem:[#allocation10 + $0x70] sm:$0xff] }
  0x93   :  { %1294 = vmatpush3.bf16.msra.mxu0 %v1293_v30  ;;  %v971_v37 = vld [vmem:[%s2024_s3] ss:$0 sm:$0xff]  ;;  %v422_v44 = vld [vmem:[#allocation10 + $0xa0] sm:$0xff]  ;;  %v428_v50 = vld [vmem:[#allocation10 + $0xd0] sm:$0xff] }
  0x94   :  { %1295 = vmatprep.subr.bf16.mxu0 %v1686_v0  ;;  %v425_v46 = vld [vmem:[#allocation10 + $0xb8] sm:$0xff]  ;;  %v431_v52 = vld [vmem:[#allocation10 + $0xe8] sm:$0xff]  ;;  %v434_v54 = vld [vmem:[#allocation10 + $0x100] sm:$0xff] }
  0x95   :  { %1311 = vmatpush1.bf16.msra.mxu1 %v1884_v51  ;;  %v1346_v48 = vpack.c.bf16 %v425_v46, %v422_v44  ;;  %v1349_v53 = vpack.c.bf16 %v431_v52, %v428_v50  ;;  %v437_v56 = vld [vmem:[#allocation10 + $0x118] sm:$0xff]  ;;  %v440_v58 = vld [vmem:[#allocation10 + $0x130] sm:$0xff]  ;;  %v777_v62 = vld [vmem:[#allocation13 + $0x8] sm:$0xff] }
  0x96   :  { %1313 = vmatprep.subr.bf16.mxu1 %v1887_v55  ;;  %v449_v60 = vld [vmem:[#allocation10 + $0x178] sm:$0xff]  ;;  %v778_v6 = vld [vmem:[#allocation13 + $0x10] sm:$0xff]  ;;  %v780_v9 = vld [vmem:[#allocation13 + $0x20] sm:$0xff] }
  0x97   :  { %1297 = vmatpush3.bf16.msra.mxu0 %v1296_v33  ;;  %v781_v10 = vld [vmem:[#allocation13 + $0x28] sm:$0xff]  ;;  %v782_v15 = vld [vmem:[#allocation13 + $0x30] sm:$0xff]  ;;  %v783_v16 = vld [vmem:[#allocation13 + $0x38] sm:$0xff] }
  0x98   :  { %1298 = vmatprep.subr.bf16.mxu0 %v1686_v0  ;;  %v1426_v18 = vpack.c.bf16 %v783_v16, %v782_v15  ;;  %v785_v20 = vld [vmem:[#allocation13 + $0x48] sm:$0xff]  ;;  %v786_v21 = vld [vmem:[#allocation13 + $0x50] sm:$0xff]  ;;  %v788_v24 = vld [vmem:[#allocation13 + $0x60] sm:$0xff] }
  0x99   :  { %1315 = vmatpush1.bf16.msra.mxu1 %v1890_v57  ;;  %v790_v27 = vld [vmem:[#allocation13 + $0x70] sm:$0xff]  ;;  %v791_v28 = vld [vmem:[#allocation13 + $0x78] sm:$0xff] }
  0x9a   :  { %1317 = vmatprep.subr.bf16.mxu1 %v1893_v61  ;;  %v766_v52 = vld [vmem:[#allocation11 + $0x30] sm:$0xff] }
  0x9b   :  { %1300 = vmatpush3.bf16.msra.mxu0 %v1299_v36  ;;  %v1340_v36 = vpack.c.bf16 %v413_v35, %v410_v34 }
  0x9c   :  { %1301 = vmatprep.subr.bf16.mxu0 %v1686_v0 }
  0x9d   :  { %1319 = vmatpush1.bf16.msra.mxu1 %v1896_v63 }
  0x9e   :  { %1321 = vmatprep.subr.bf16.mxu1 %v1899_v5 }
  0x9f   :  { %1303 = vmatpush3.bf16.msra.mxu0 %v1302_v39  ;;  %v419_v39 = vld [vmem:[#allocation10 + $0x88] sm:$0xff] }
  0xa0   :  { %1336 = vmatprep.subr.bf16.mxu0 %v1686_v0 }
  0xa1   :  { %1323 = vmatpush1.bf16.msra.mxu1 %v1902_v7 }
  0xa2   :  { %1325 = vmatprep.subr.bf16.mxu1 %v1905_v11 }
  0xa5   :  { %1327 = vmatpush1.bf16.msra.mxu1 %v1908_v13 }
  0xa6   :  { %1329 = vmatprep.subr.bf16.mxu1 %v1911_v17 }
  0xa9   :  { %1331 = vmatpush1.bf16.msra.mxu1 %v1914_v19 }
  0xaa   :  { %1333 = vmatprep.subr.bf16.mxu1 %v1917_v22 }
  0xad   :  { %1335 = vmatpush1.bf16.msra.mxu1 %v1920_v25 }
  0xae   :  { %1361 = vmatprep.subr.bf16.mxu1 %v1304_v43  ;;  %v1343_v43 = vpack.c.bf16 %v419_v39, %v416_v38 }
 0x15b   :  { %v218_v29 = vpop.f32.mrb[0].mxu1 }
 0x15c   :  { %v1927_v30 = vadd.f32 %v969_v26, %v218_v29  ;;  %v1081_v31 = vpop.f32.mrb[1].mxu1  ;;  %v1438_v29 = vpack.c.bf16 %v791_v28, %v790_v27 }
 0x15e   :  { %v222_v33 = vmax.f32 %v1927_v30, 0.0  ;;  %v762_v30 = vld [vmem:[#allocation11 + $0x10] sm:$0xff] }
 0x160   :  { %1126 = vmatmul.mubr.f32.vlgmr.msra.gmra.mrb[0].mxu0 %v222_v33 }
 0x161   :  { %1338 = vmatpush3.bf16.msra.mxu0 %v1337_v32  ;;  %1160 = vmatprep.mubr.msk.f32.mxu0 %vm1687_vm0, %v1688_v1 }
 0x162   :  { %1339 = vmatprep.subr.bf16.mxu0 %v1686_v0 }
 0x163   :  { %v303_v40 = vpop.f32.mrb[2].mxu1 }
 0x164   :  { %v304_v41 = vadd.f32 %v971_v37, %v303_v40  ;;  %v1092_v42 = vpop.f32.mrb[3].mxu1  ;;  %v760_v40 = vld [vmem:[#allocation11] sm:$0xff] }
 0x165   :  { %1341 = vmatpush3.bf16.msra.mxu0 %v1340_v36 }
 0x166   :  { %1342 = vmatprep.subr.bf16.mxu0 %v1686_v0  ;;  %v307_v47 = vmax.f32 %v304_v41, 0.0  ;;  %v761_v41 = vld [vmem:[#allocation11 + $0x8] sm:$0xff] }
 0x167   :  { %v1441_v42 = vpack.c.bf16 %v761_v41, %v760_v40 }
 0x168   :  { %515 = vmatmul.mubr.f32.vlgmr.msra.gmra.mrb[4].mxu1 %v307_v47 }
 0x169   :  { %1344 = vmatpush3.bf16.msra.mxu0 %v1343_v43  ;;  %1363 = vmatpush1.bf16.msra.mxu1 %v1879_v45  ;;  %v1352_v45 = vpack.c.bf16 %v437_v56, %v434_v54  ;;  %v768_v56 = vld [vmem:[#allocation11 + $0x40] sm:$0xff] }
 0x16a   :  { %1345 = vmatprep.subr.bf16.mxu0 %v1686_v0  ;;  %1365 = vmatprep.subr.bf16.mxu1 %v1881_v49  ;;  %v443_v49 = vld [vmem:[#allocation10 + $0x148] sm:$0xff] }
 0x16b   :  { %655 = vmatprep.mubr.f32.mxu1 %v1688_v1  ;;  %v1355_v59 = vpack.c.bf16 %v443_v49, %v440_v58  ;;  %v770_v49 = vld [vmem:[#allocation11 + $0x50] sm:$0xff] }
 0x16d   :  { %1347 = vmatpush3.bf16.msra.mxu0 %v1346_v48  ;;  %1367 = vmatpush1.bf16.msra.mxu1 %v1884_v51  ;;  %v446_v51 = vld [vmem:[#allocation10 + $0x160] sm:$0xff] }
 0x16e   :  { %1348 = vmatprep.subr.bf16.mxu0 %v1686_v0  ;;  %1369 = vmatprep.subr.bf16.mxu1 %v1887_v55  ;;  %v1358_v55 = vpack.c.bf16 %v449_v60, %v446_v51  ;;  %v772_v60 = vld [vmem:[#allocation11 + $0x60] sm:$0xff] }
 0x171   :  { %1350 = vmatpush3.bf16.msra.mxu0 %v1349_v53  ;;  %1371 = vmatpush1.bf16.msra.mxu1 %v1890_v57  ;;  %v973_v57 = vld [vmem:[%s2028_s7] ss:$0 sm:$0xff] }
 0x172   :  { %1351 = vmatprep.subr.bf16.mxu0 %v1686_v0  ;;  %1373 = vmatprep.subr.bf16.mxu1 %v1893_v61  ;;  %v776_v61 = vld [vmem:[#allocation13] sm:$0xff] }
 0x173   :  { %v1417_v4 = vpack.c.bf16 %v777_v62, %v776_v61  ;;  %v774_v61 = vld [vmem:[#allocation11 + $0x70] sm:$0xff]  ;;  %v775_v62 = vld [vmem:[#allocation11 + $0x78] sm:$0xff] }
 0x175   :  { %1353 = vmatpush3.bf16.msra.mxu0 %v1352_v45  ;;  %1375 = vmatpush1.bf16.msra.mxu1 %v1896_v63 }
 0x176   :  { %1354 = vmatprep.subr.bf16.mxu0 %v1686_v0  ;;  %1377 = vmatprep.subr.bf16.mxu1 %v1899_v5 }
 0x179   :  { %1356 = vmatpush3.bf16.msra.mxu0 %v1355_v59  ;;  %1379 = vmatpush1.bf16.msra.mxu1 %v1902_v7  ;;  %v779_v7 = vld [vmem:[#allocation13 + $0x18] sm:$0xff] }
 0x17a   :  { %1357 = vmatprep.subr.bf16.mxu0 %v1686_v0  ;;  %1381 = vmatprep.subr.bf16.mxu1 %v1905_v11  ;;  %v1420_v8 = vpack.c.bf16 %v779_v7, %v778_v6 }
 0x17d   :  { %1359 = vmatpush3.bf16.msra.mxu0 %v1358_v55  ;;  %1383 = vmatpush1.bf16.msra.mxu1 %v1908_v13  ;;  %v1423_v13 = vpack.c.bf16 %v781_v10, %v780_v9 }
 0x17e   :  { %1392 = vmatprep.subr.bf16.mxu0 %v1686_v0  ;;  %1385 = vmatprep.subr.bf16.mxu1 %v1911_v17 }
 0x180   :  { %1161 = vmatmul.mubr.f32.vlgmr.msra.gmra.mrb[2].mxu0 %v307_v47  ;;  %v764_v47 = vld [vmem:[#allocation11 + $0x20] sm:$0xff] }
 0x181   :  { %1394 = vmatpush3.bf16.msra.mxu0 %v1337_v32  ;;  %1387 = vmatpush1.bf16.msra.mxu1 %v1914_v19  ;;  %v784_v19 = vld [vmem:[#allocation13 + $0x40] sm:$0xff] }
 0x182   :  { %1395 = vmatprep.subr.bf16.mxu0 %v1686_v0  ;;  %1389 = vmatprep.subr.bf16.mxu1 %v1917_v22  ;;  %v787_v22 = vld [vmem:[#allocation13 + $0x58] sm:$0xff] }
 0x183   :  { %1195 = vmatprep.mubr.msk.f32.mxu0 %vm1687_vm0, %v1688_v1  ;;  %v1432_v23 = vpack.c.bf16 %v787_v22, %v786_v21  ;;  %v974_v22 = vld [vmem:[%s2032_s11] ss:$0 sm:$0xff] }
 0x185   :  { %1397 = vmatpush3.bf16.msra.mxu0 %v1340_v36  ;;  %1391 = vmatpush1.bf16.msra.mxu1 %v1920_v25  ;;  %v789_v25 = vld [vmem:[#allocation13 + $0x68] sm:$0xff] }
 0x186   :  { %1398 = vmatprep.subr.bf16.mxu0 %v1686_v0  ;;  %1416 = vmatprep.subr.bf16.mxu1 %v1686_v0  ;;  %v1435_v26 = vpack.c.bf16 %v789_v25, %v788_v24 }
 0x189   :  { %1400 = vmatpush3.bf16.msra.mxu0 %v1343_v43 }
 0x18a   :  { %1401 = vmatprep.subr.bf16.mxu0 %v1686_v0 }
 0x18d   :  { %1403 = vmatpush3.bf16.msra.mxu0 %v1346_v48  ;;  %v765_v48 = vld [vmem:[#allocation11 + $0x28] sm:$0xff] }
 0x18e   :  { %1404 = vmatprep.subr.bf16.mxu0 %v1686_v0  ;;  %v1447_v50 = vpack.c.bf16 %v765_v48, %v764_v47 }
 0x191   :  { %1406 = vmatpush3.bf16.msra.mxu0 %v1349_v53  ;;  %v767_v53 = vld [vmem:[#allocation11 + $0x38] sm:$0xff] }
 0x192   :  { %1407 = vmatprep.subr.bf16.mxu0 %v1686_v0  ;;  %v1450_v54 = vpack.c.bf16 %v767_v53, %v766_v52 }
 0x195   :  { %1409 = vmatpush3.bf16.msra.mxu0 %v1352_v45  ;;  %v769_v45 = vld [vmem:[#allocation11 + $0x48] sm:$0xff] }
 0x196   :  { %1410 = vmatprep.subr.bf16.mxu0 %v1686_v0  ;;  %v1453_v58 = vpack.c.bf16 %v769_v45, %v768_v56 }
 0x199   :  { %1412 = vmatpush3.bf16.msra.mxu0 %v1355_v59  ;;  %v771_v59 = vld [vmem:[#allocation11 + $0x58] sm:$0xff] }
 0x19a   :  { %1413 = vmatprep.subr.bf16.mxu0 %v1686_v0  ;;  %v1456_v51 = vpack.c.bf16 %v771_v59, %v770_v49 }
 0x19d   :  { %1415 = vmatpush3.bf16.msra.mxu0 %v1358_v55  ;;  %v773_v55 = vld [vmem:[#allocation11 + $0x68] sm:$0xff] }
 0x19e   :  { %1440 = vmatprep.subr.bf16.mxu0 %v1686_v0 }
 0x233   :  { %v397_v63 = vpop.f32.mrb[0].mxu0 }
 0x234   :  { %v398_v2 = vadd.f32 %v973_v57, %v397_v63  ;;  %v1127_v3 = vpop.f32.mrb[1].mxu0  ;;  %v1459_v57 = vpack.c.bf16 %v773_v55, %v772_v60  ;;  %v1462_v63 = vpack.c.bf16 %v775_v62, %v774_v61 }
 0x236   :  { %v401_v5 = vmax.f32 %v398_v2, 0.0 }
 0x238   :  { %656 = vmatmul.mubr.f32.vlgmr.msra.gmra.mrb[6].mxu1 %v401_v5  ;;  %1196 = vmatmul.mubr.f32.vlgmr.msra.gmra.mrb[4].mxu0 %v401_v5 }
 0x239   :  { %1418 = vmatpush3.bf16.msra.mxu1 %v1417_v4  ;;  %1230 = vmatprep.mubr.msk.f32.mxu1 %vm1687_vm0, %v1688_v1 }
 0x23a   :  { %1419 = vmatprep.subr.bf16.mxu1 %v1686_v0  ;;  %1265 = vmatprep.mubr.msk.f32.mxu0 %vm1687_vm0, %v1688_v1  ;;  %v1429_v1 = vpack.c.bf16 %v785_v20, %v784_v19 }
 0x23b   :  { %v516_v11 = vpop.f32.mrb[4].mxu1  ;;  %1442 = vmatpush3.bf16.msra.mxu0 %v1441_v42 }
 0x23c   :  { %v518_v12 = vpop.f32.mrb[5].mxu1  ;;  %1443 = vmatprep.subr.bf16.mxu0 %v1686_v0 }
 0x23d   :  { %1421 = vmatpush3.bf16.msra.mxu1 %v1420_v8  ;;  %v732_v14 = vmul.f32 %v518_v12, %v516_v11 }
 0x23e   :  { %1422 = vmatprep.subr.bf16.mxu1 %v1686_v0 }
 0x23f   :  { %v734_v17 = vsel %vm733_vm2, %v732_v14, 0.0 }
 0x240   :  { %735 = vadd.xlane.f32.xlu0 %v734_v17 }
 0x241   :  { %1424 = vmatpush3.bf16.msra.mxu1 %v1423_v13 }
 0x242   :  { %1425 = vmatprep.subr.bf16.mxu1 %v1686_v0 }
 0x245   :  { %1427 = vmatpush3.bf16.msra.mxu1 %v1426_v18 }
 0x246   :  { %1428 = vmatprep.subr.bf16.mxu1 %v1686_v0 }
 0x249   :  { %1430 = vmatpush3.bf16.msra.mxu1 %v1429_v1 }
 0x24a   :  { %1431 = vmatprep.subr.bf16.mxu1 %v1686_v0 }
 0x24d   :  { %1433 = vmatpush3.bf16.msra.mxu1 %v1432_v23 }
 0x24e   :  { %1434 = vmatprep.subr.bf16.mxu1 %v1686_v0 }
 0x251   :  { %1436 = vmatpush3.bf16.msra.mxu1 %v1435_v26 }
 0x252   :  { %1437 = vmatprep.subr.bf16.mxu1 %v1686_v0 }
 0x253   :  { %v1987_v31 = vpop.f32.mrb[2].mxu0 }
 0x254   :  { %v1162_v32 = vpop.f32.mrb[3].mxu0 }
 0x255   :  { %1439 = vmatpush3.bf16.msra.mxu1 %v1438_v29  ;;  %v940_v29 = vlaneseq }
 0x258   :  { %1231 = vmatmul.mubr.f32.vlgmr.msra.gmra.mrb[8].mxu1 %v222_v33  ;;  %v763_v33 = vld [vmem:[#allocation11 + $0x18] sm:$0xff] }
 0x259   :  { %v1444_v46 = vpack.c.bf16 %v763_v33, %v762_v30 }
 0x25b   :  { %1445 = vmatpush3.bf16.msra.mxu0 %v1444_v46 }
 0x25c   :  { %1446 = vmatprep.subr.bf16.mxu0 %v1686_v0 }
 0x25f   :  { %1448 = vmatpush3.bf16.msra.mxu0 %v1447_v50 }
 0x260   :  { %1449 = vmatprep.subr.bf16.mxu0 %v1686_v0 }
 0x263   :  { %1451 = vmatpush3.bf16.msra.mxu0 %v1450_v54 }
 0x264   :  { %1452 = vmatprep.subr.bf16.mxu0 %v1686_v0 }
 0x267   :  { %1454 = vmatpush3.bf16.msra.mxu0 %v1453_v58 }
 0x268   :  { %1455 = vmatprep.subr.bf16.mxu0 %v1686_v0 }
 0x26b   :  { %1457 = vmatpush3.bf16.msra.mxu0 %v1456_v51 }
 0x26c   :  { %1458 = vmatprep.subr.bf16.mxu0 %v1686_v0 }
 0x26f   :  { %1460 = vmatpush3.bf16.msra.mxu0 %v1459_v57 }
 0x270   :  { %1461 = vmatprep.subr.bf16.mxu0 %v1686_v0 }
 0x273   :  { %1463 = vmatpush3.bf16.msra.mxu0 %v1462_v63 }
 0x2cd   :  { %v736_v2 = vpop.xlane.xlu0 %735 }
 0x2ce   :  { %v737_v4 = vmul.f32 0.25, %v736_v2 }
 0x30b   :  { %v657_v34 = vpop.f32.mrb[6].mxu1  ;;  %v1991_v35 = vpop.f32.mrb[4].mxu0 }
 0x30c   :  { %v659_v36 = vpop.f32.mrb[7].mxu1  ;;  %v1197_v37 = vpop.f32.mrb[5].mxu0 }
 0x30d   :  { %v738_v38 = vmul.f32 %v659_v36, %v657_v34 }
 0x30f   :  { %v739_v39 = vsel %vm733_vm2, %v738_v38, 0.0 }
 0x310   :  { %740 = vadd.xlane.f32.xlu0 %v739_v39 }
 0x32b   :  { %v1994_v43 = vpop.f32.mrb[8].mxu1 }
 0x32c   :  { %v1232_v44 = vpop.f32.mrb[9].mxu1 }
 0x39d   :  { %v741_v3 = vpop.xlane.xlu0 %740 }
 0x39e   :  { %v742_v5 = vmul.f32 0.25, %v741_v3 }
 0x3a0   :  { %v743_v6 = vmax.f32 %v737_v4, %v742_v5 }
 0x3a2   :  { %v744_v7 = vsub.f32 %v737_v4, %v743_v6  ;;  %v747_v8 = vsub.f32 %v742_v5, %v743_v6 }
 0x3a4   :  { %v745_v9 = vmul.f32 1.442695, %v744_v7  ;;  %v748_v10 = vmul.f32 1.442695, %v747_v8 }
 0x3a6   :  { %1479 = vpow2.f32 %v745_v9 }
 0x3a7   :  { %1481 = vpow2.f32 %v748_v10 }
 0x3b0   :  { %v1480_v11 = vpop.eup %1479 }
 0x3b1   :  { %v1482_v12 = vpop.eup %1481 }
 0x3b2   :  { %v750_v13 = vadd.f32 %v1482_v12, %v1480_v11 }
 0x3b4   :  { %1483 = vrcp.f32 %v750_v13 }
 0x3be   :  { %v1484_v14 = vpop.eup %1483 }
 0x3bf   :  { %v752_v15 = vmul.f32 %v1484_v14, %v750_v13 }
 0x3c1   :  { %v753_v16 = vsub.f32 2.0, %v752_v15 }
 0x3c3   :  { %v754_v0 = vmul.f32 %v1484_v14, %v753_v16 }
 0x3c5   :  { %v755_v17 = vmul.f32 %v1480_v11, %v754_v0  ;;  %v757_v18 = vmul.f32 %v1482_v12, %v754_v0 }
 0x3c7   :  { %v756_v19 = vmul.f32 %v755_v17, %v1987_v31  ;;  %v758_v20 = vmul.f32 %v757_v18, %v1991_v35  ;;  %v941_v31 = vand.u32 127, %v940_v29 }
 0x3c9   :  { %v759_v1 = vadd.f32 %v758_v20, %v756_v19  ;;  %vm942_vm3 = vcmp.eq.s32.totalorder %v941_v31, 5 }
 0x3cb   :  { %1266 = vmatmul.mubr.f32.vlgmr.msra.gmra.mrb[6].mxu0 %v759_v1 }
 0x49e   :  { %v928_v21 = vpop.f32.mrb[6].mxu0 }
 0x49f   :  { %v929_v23 = vadd.f32 %v928_v21, %v1994_v43  ;;  %v1267_v24 = vpop.f32.mrb[7].mxu0 }
 0x4a1   :  { %v939_v25 = vadd.f32 %v974_v22, %v929_v23 }
 0x4a3   :  { %v975_v26 = vmul.f32 -1.442695, %v939_v25 }
 0x4a5   :  { %1485 = vpow2.f32 %v975_v26 }
 0x4af   :  { %v1486_v27 = vpop.eup %1485 }
 0x4b0   :  { %v946_v28 = vadd.f32 1.0, %v1486_v27 }
 0x4b2   :  { %1487 = vrcp.f32 %v946_v28 }
 0x4bc   :  { %v1488_v32 = vpop.eup %1487 }
 0x4bd   :  { %v949_v34 = vsel %vm942_vm3, %v1488_v32, %v939_v25 }
 0x4be   :  { %950 = vst [vmem:[#allocation14] sm:$0x3] %v949_v34 }
 0x4bf   :  { %1654 = shalt.err (!%p1651_p4)
}
 0x4c0   :  { %s1655_s28 = scalar_lea.hbm %s2033_s12, 32 }
 0x4c1   :  { %p1656_p5 = scmp.ne.s32.totalorder %s2033_s12, %s1655_s28  ;;  %p1659_p6 = scmp.lt.u32.totalorder %s1655_s28, %s2033_s12 }
 0x4c3   :  { %p1661_p7 = pnand %p1659_p6, %p1656_p5 }
 0x4c5   :  { %1664 = shalt.err (!%p1661_p7)
}
 0x4c6   :  { %960 = dma.vmem_to_hbm [thread:$0]  %s958_s19, 32, %s2033_s12, [#allocation4]  }
 0x4c7   :  { %1673 = dma.done.wait [#allocation4], 32  }
 0x4c8   :  { %1674 = vsyncadd [#allocation4], 4294967264 }
 0x4c9   :  { %964 = vsyncpa [#allocation3], 1 }
 0x4ca   :  { %965 = vsyncpa [#allocation6], 1 }
 0x4cb   :  { %966 = vsyncpa [#allocation9], 1 }
 0x4cc   :  { %967 = vsyncpa [#allocation12], 1 }
 0x4cd   :  { %968 = vsyncpa [#allocation4], 1 }

</bundles_post_ra>
